<compile_context>
chip_gen: v7x
topology: tpu7x:2x2x1
jax: 0.10.0
libtpu: 0.0.40
codegen_flags: <defaults>
</compile_context>

<pallas_src>
import jax
import jax.numpy as jnp
from jax.experimental import pallas as pl
from jax.experimental.pallas import tpu as pltpu

IMAGE_HEIGHT = 28
IMAGE_WIDTH = 28
INPUT_SIZE = IMAGE_WIDTH * IMAGE_HEIGHT   # 784
LAYER_SIZE = 64
OUTPUT_SIZE = 10
PADDED_OUT = 128          # lane-dense output width (multiple of 128)
DEFAULT_TILE_B = 2048     # ~3.2 MiB bf16 x-tile; double-buffered fits every gen's VMEM
NEG_BIG = -1e30           # "minus infinity" bias for padded class columns


def mlp_kernel(x_ref, w1_ref, b1_ref, w2_ref, b2_ref, w3_ref, b3_ref,
               w4_ref, b4_ref, o_ref):
    # layer 1: relu(x @ W1 + b1); x cast to bf16 in-kernel (no-op if already bf16)
    x = x_ref[...].astype(jnp.bfloat16)
    h = jnp.dot(x, w1_ref[...], preferred_element_type=jnp.float32)
    h = jnp.maximum(h + b1_ref[...], 0.0).astype(jnp.bfloat16)
    # layer 2
    h = jnp.dot(h, w2_ref[...], preferred_element_type=jnp.float32)
    h = jnp.maximum(h + b2_ref[...], 0.0).astype(jnp.bfloat16)
    # layer 3
    h = jnp.dot(h, w3_ref[...], preferred_element_type=jnp.float32)
    h = jnp.maximum(h + b3_ref[...], 0.0).astype(jnp.bfloat16)
    # output layer, padded to 128 lanes. Padded columns have weight 0 and bias
    # -1e30, so exp(shifted) is exactly 0 there and the log_softmax over the
    # first 10 columns is unchanged.
    logits = jnp.dot(h, w4_ref[...], preferred_element_type=jnp.float32) + b4_ref[...]
    m = jnp.max(logits, axis=-1, keepdims=True)
    shifted = logits - m
    lse = jnp.log(jnp.sum(jnp.exp(shifted), axis=-1, keepdims=True))
    o_ref[...] = (shifted - lse).astype(o_ref.dtype)


def net_forward(x, params, tile_b=None, return_padded=False):
    """Forward pass of Net. x: (B, 784) f32 or bf16. Returns (B, 10) log-probs
    (f32), or the raw bf16 (B_padded, 128) slab if return_padded=True."""
    (w1, b1), (w2, b2), (w3, b3), (w4, b4) = params
    B = x.shape[0]

    # ---- batch tiling / padding ------------------------------------------
    if tile_b is None:
        tile_b = DEFAULT_TILE_B
    b_pad8 = ((B + 7) // 8) * 8                      # sublane multiple
    tile_b = min(((tile_b + 7) // 8) * 8, b_pad8)
    n_tiles = pl.cdiv(B, tile_b)
    b_padded = n_tiles * tile_b
    if b_padded != B:
        # zero rows are harmless through the MLP/log_softmax and are sliced off
        x = jnp.pad(x, ((0, b_padded - B), (0, 0)))

    # ---- weight plumbing (tiny, one-time) ----------------------------------
    # All matmul operands bf16 (MXU-native), f32 accumulation in-kernel.
    w1_b = w1.astype(jnp.bfloat16)
    w2_b = w2.astype(jnp.bfloat16)
    w3_b = w3.astype(jnp.bfloat16)
    # lane-dense final layer: pad classes 10..127 (zero weights, -1e30 bias)
    w4_b = jnp.pad(w4, ((0, 0), (0, PADDED_OUT - OUTPUT_SIZE))).astype(jnp.bfloat16)
    b4_p = jnp.pad(b4, ((0, 0), (0, PADDED_OUT - OUTPUT_SIZE)),
                   constant_values=NEG_BIG)

    # weights/biases: constant index_map -> fetched once, stay VMEM-resident
    def const(shape):
        return pl.BlockSpec(shape, lambda i: (0, 0))

    in_specs = [
        pl.BlockSpec((tile_b, INPUT_SIZE), lambda i: (i, 0)),      # x tile
        const((INPUT_SIZE, LAYER_SIZE)), const((1, LAYER_SIZE)),   # w1, b1
        const((LAYER_SIZE, LAYER_SIZE)), const((1, LAYER_SIZE)),   # w2, b2
        const((LAYER_SIZE, LAYER_SIZE)), const((1, LAYER_SIZE)),   # w3, b3
        const((LAYER_SIZE, PADDED_OUT)), const((1, PADDED_OUT)),   # w4, b4 (padded)
    ]
    out_spec = pl.BlockSpec((tile_b, PADDED_OUT), lambda i: (i, 0))

    # ---- cost estimate ------------------------------------------------------
    x_bytes = jnp.dtype(x.dtype).itemsize
    weight_bytes = (w1_b.size + w2_b.size + w3_b.size + w4_b.size) * 2 \
                   + (b1.size + b2.size + b3.size + b4_p.size) * 4
    flops = 2 * b_padded * (INPUT_SIZE * LAYER_SIZE
                            + 2 * LAYER_SIZE * LAYER_SIZE
                            + LAYER_SIZE * PADDED_OUT)
    bytes_accessed = (b_padded * INPUT_SIZE * x_bytes       # x stream
                      + weight_bytes                         # weights (once)
                      + b_padded * PADDED_OUT * 2)           # bf16 output slab
    cost = pl.CostEstimate(flops=flops,
                           transcendentals=b_padded * (PADDED_OUT + 1),
                           bytes_accessed=bytes_accessed)

    # ---- compiler params: bump scoped VMEM only if the working set needs it --
    # (double-buffered x tile + double-buffered out tile + resident weights)
    vmem_est = 2 * tile_b * INPUT_SIZE * x_bytes + 2 * tile_b * PADDED_OUT * 2 \
               + weight_bytes
    cp_kwargs = dict(dimension_semantics=("parallel",))
    if vmem_est > (12 << 20):            # v5e default scoped limit is 16 MiB
        cp_kwargs["vmem_limit_bytes"] = min(48 << 20, max(32 << 20, 2 * vmem_est))

    out_padded = pl.pallas_call(
        mlp_kernel,
        out_shape=jax.ShapeDtypeStruct((b_padded, PADDED_OUT), jnp.bfloat16),
        grid=(n_tiles,),
        in_specs=in_specs,
        out_specs=out_spec,
        compiler_params=pltpu.CompilerParams(**cp_kwargs),
        cost_estimate=cost,
    )(x, w1_b, b1, w2_b, b2, w3_b, b3, w4_b, b4_p)

    if return_padded:
        # Downstream consumers (NLL gather / argmax) can read the slab directly
        # and skip this slice copy entirely.
        return out_padded
    return out_padded[:B, :OUTPUT_SIZE].astype(jnp.float32)


def init_params(key):
    """PyTorch-style uniform(-1/sqrt(fan_in), 1/sqrt(fan_in)) init, deterministic."""
    dims = [(INPUT_SIZE, LAYER_SIZE),
            (LAYER_SIZE, LAYER_SIZE),
            (LAYER_SIZE, LAYER_SIZE),
            (LAYER_SIZE, OUTPUT_SIZE)]
    params = []
    for (fan_in, fan_out) in dims:
        key, kw, kb = jax.random.split(key, 3)
        bound = 1.0 / (fan_in ** 0.5)
        w = jax.random.uniform(kw, (fan_in, fan_out), jnp.float32, -bound, bound)
        # biases kept 2D (1, fan_out) so they broadcast cleanly in the kernel
        b = jax.random.uniform(kb, (1, fan_out), jnp.float32, -bound, bound)
        params.append((w, b))
    return params


def reference_forward(x, params):
    h = x
    for (w, b) in params[:-1]:
        h = jnp.maximum(h @ w + b, 0.0)
    logits = h @ params[-1][0] + params[-1][1]
    return jax.nn.log_softmax(logits, axis=1)


if __name__ == "__main__":
    key = jax.random.PRNGKey(0)
    key, kx = jax.random.split(key)
    B = 8
    x = jax.random.normal(kx, (B, INPUT_SIZE), jnp.float32)
    params = init_params(key)

    out = net_forward(x, params)
    jax.block_until_ready(out)

    ref = reference_forward(x, params)
    assert out.shape == (B, OUTPUT_SIZE)
    # bf16 matmul operands + bf16 output slab -> loosened tolerance vs. f32 ref
    assert jnp.allclose(out, ref, atol=3e-2, rtol=3e-2), \
        f"max abs err {float(jnp.max(jnp.abs(out - ref)))}"

    # exercise the multi-tile grid + ragged-tail padding path
    B2 = 20
    key, kx2 = jax.random.split(key)
    x2 = jax.random.normal(kx2, (B2, INPUT_SIZE), jnp.float32)
    out2 = net_forward(x2, params, tile_b=8)   # 3 tiles, last tile half-padded
    jax.block_until_ready(out2)
    ref2 = reference_forward(x2, params)
    assert out2.shape == (B2, OUTPUT_SIZE)
    assert jnp.allclose(out2, ref2, atol=3e-2, rtol=3e-2), \
        f"max abs err {float(jnp.max(jnp.abs(out2 - ref2)))}"

    # bf16-producer path (no cast anywhere): kernel consumes bf16 x directly
    out3 = net_forward(x.astype(jnp.bfloat16), params)
    jax.block_until_ready(out3)
    assert jnp.allclose(out3, ref, atol=3e-2, rtol=3e-2), \
        f"max abs err {float(jnp.max(jnp.abs(out3 - ref)))}"

    print("KERNEL_OK")
</pallas_src>

<mosaic_0001>
module attributes {stable_mosaic.version = 11 : i64} {
  func.func @mlp_kernel(%arg0: i32, %arg1: memref<8x784xf32, #tpu.memory_space<vmem>>, %arg2: memref<784x64xbf16, #tpu.memory_space<vmem>>, %arg3: memref<1x64xf32, #tpu.memory_space<vmem>>, %arg4: memref<64x64xbf16, #tpu.memory_space<vmem>>, %arg5: memref<1x64xf32, #tpu.memory_space<vmem>>, %arg6: memref<64x64xbf16, #tpu.memory_space<vmem>>, %arg7: memref<1x64xf32, #tpu.memory_space<vmem>>, %arg8: memref<64x128xbf16, #tpu.memory_space<vmem>>, %arg9: memref<1x128xf32, #tpu.memory_space<vmem>>, %arg10: memref<8x128xbf16, #tpu.memory_space<vmem>>) attributes {dimension_semantics = [#tpu.dimension_semantics<parallel>], iteration_bounds = array<i64: 1>, scalar_prefetch = 0 : i64, scratch_operands = 0 : i64, tpu.core_type = #tpu.core_type<tc>, window_params = [{transform_indices = @transform_0, window_bounds = array<i64: 8, 784>}, {pipeline_mode = #tpu.pipeline_mode<synchronous>, transform_indices = @transform_1, window_bounds = array<i64: 784, 64>}, {pipeline_mode = #tpu.pipeline_mode<synchronous>, transform_indices = @transform_2, window_bounds = array<i64: 1, 64>}, {pipeline_mode = #tpu.pipeline_mode<synchronous>, transform_indices = @transform_3, window_bounds = array<i64: 64, 64>}, {pipeline_mode = #tpu.pipeline_mode<synchronous>, transform_indices = @transform_4, window_bounds = array<i64: 1, 64>}, {pipeline_mode = #tpu.pipeline_mode<synchronous>, transform_indices = @transform_5, window_bounds = array<i64: 64, 64>}, {pipeline_mode = #tpu.pipeline_mode<synchronous>, transform_indices = @transform_6, window_bounds = array<i64: 1, 64>}, {pipeline_mode = #tpu.pipeline_mode<synchronous>, transform_indices = @transform_7, window_bounds = array<i64: 64, 128>}, {pipeline_mode = #tpu.pipeline_mode<synchronous>, transform_indices = @transform_8, window_bounds = array<i64: 1, 128>}, {transform_indices = @transform_9, window_bounds = array<i64: 8, 128>}]} {
    %c0 = arith.constant 0 : index
    %c0_0 = arith.constant 0 : index
    %0 = vector.load %arg1[%c0, %c0_0] : memref<8x784xf32, #tpu.memory_space<vmem>>, vector<8x784xf32>
    %1 = arith.truncf %0 : vector<8x784xf32> to vector<8x784xbf16>
    %c0_1 = arith.constant 0 : index
    %c0_2 = arith.constant 0 : index
    %2 = vector.load %arg2[%c0_1, %c0_2] : memref<784x64xbf16, #tpu.memory_space<vmem>>, vector<784x64xbf16>
    %cst = arith.constant dense<0.000000e+00> : vector<8x64xf32>
    %3 = tpu.matmul %1, %2, %cst {dimension_numbers = #tpu.dot_dimension_numbers<[1], [0], [0], [1], [0, 0, 1, 1], [], []>} : vector<8x784xbf16>, vector<784x64xbf16>, vector<8x64xf32> -> vector<8x64xf32>
    %c0_3 = arith.constant 0 : index
    %c0_4 = arith.constant 0 : index
    %4 = vector.load %arg3[%c0_3, %c0_4] : memref<1x64xf32, #tpu.memory_space<vmem>>, vector<1x64xf32>
    %5 = vector.broadcast %4 : vector<1x64xf32> to vector<8x64xf32>
    %6 = arith.addf %3, %5 : vector<8x64xf32>
    %cst_5 = arith.constant 0.000000e+00 : f32
    %7 = vector.broadcast %cst_5 : f32 to vector<8x64xf32>
    %8 = arith.maximumf %6, %7 : vector<8x64xf32>
    %9 = arith.truncf %8 : vector<8x64xf32> to vector<8x64xbf16>
    %c0_6 = arith.constant 0 : index
    %c0_7 = arith.constant 0 : index
    %10 = vector.load %arg4[%c0_6, %c0_7] : memref<64x64xbf16, #tpu.memory_space<vmem>>, vector<64x64xbf16>
    %cst_8 = arith.constant dense<0.000000e+00> : vector<8x64xf32>
    %11 = tpu.matmul %9, %10, %cst_8 {dimension_numbers = #tpu.dot_dimension_numbers<[1], [0], [0], [1], [0, 0, 1, 1], [], []>} : vector<8x64xbf16>, vector<64x64xbf16>, vector<8x64xf32> -> vector<8x64xf32>
    %c0_9 = arith.constant 0 : index
    %c0_10 = arith.constant 0 : index
    %12 = vector.load %arg5[%c0_9, %c0_10] : memref<1x64xf32, #tpu.memory_space<vmem>>, vector<1x64xf32>
    %13 = vector.broadcast %12 : vector<1x64xf32> to vector<8x64xf32>
    %14 = arith.addf %11, %13 : vector<8x64xf32>
    %cst_11 = arith.constant 0.000000e+00 : f32
    %15 = vector.broadcast %cst_11 : f32 to vector<8x64xf32>
    %16 = arith.maximumf %14, %15 : vector<8x64xf32>
    %17 = arith.truncf %16 : vector<8x64xf32> to vector<8x64xbf16>
    %c0_12 = arith.constant 0 : index
    %c0_13 = arith.constant 0 : index
    %18 = vector.load %arg6[%c0_12, %c0_13] : memref<64x64xbf16, #tpu.memory_space<vmem>>, vector<64x64xbf16>
    %cst_14 = arith.constant dense<0.000000e+00> : vector<8x64xf32>
    %19 = tpu.matmul %17, %18, %cst_14 {dimension_numbers = #tpu.dot_dimension_numbers<[1], [0], [0], [1], [0, 0, 1, 1], [], []>} : vector<8x64xbf16>, vector<64x64xbf16>, vector<8x64xf32> -> vector<8x64xf32>
    %c0_15 = arith.constant 0 : index
    %c0_16 = arith.constant 0 : index
    %20 = vector.load %arg7[%c0_15, %c0_16] : memref<1x64xf32, #tpu.memory_space<vmem>>, vector<1x64xf32>
    %21 = vector.broadcast %20 : vector<1x64xf32> to vector<8x64xf32>
    %22 = arith.addf %19, %21 : vector<8x64xf32>
    %cst_17 = arith.constant 0.000000e+00 : f32
    %23 = vector.broadcast %cst_17 : f32 to vector<8x64xf32>
    %24 = arith.maximumf %22, %23 : vector<8x64xf32>
    %25 = arith.truncf %24 : vector<8x64xf32> to vector<8x64xbf16>
    %c0_18 = arith.constant 0 : index
    %c0_19 = arith.constant 0 : index
    %26 = vector.load %arg8[%c0_18, %c0_19] : memref<64x128xbf16, #tpu.memory_space<vmem>>, vector<64x128xbf16>
    %cst_20 = arith.constant dense<0.000000e+00> : vector<8x128xf32>
    %27 = tpu.matmul %25, %26, %cst_20 {dimension_numbers = #tpu.dot_dimension_numbers<[1], [0], [0], [1], [0, 0, 1, 1], [], []>} : vector<8x64xbf16>, vector<64x128xbf16>, vector<8x128xf32> -> vector<8x128xf32>
    %c0_21 = arith.constant 0 : index
    %c0_22 = arith.constant 0 : index
    %28 = vector.load %arg9[%c0_21, %c0_22] : memref<1x128xf32, #tpu.memory_space<vmem>>, vector<1x128xf32>
    %29 = vector.broadcast %28 : vector<1x128xf32> to vector<8x128xf32>
    %30 = arith.addf %27, %29 : vector<8x128xf32>
    %cst_23 = arith.constant dense<0xFF800000> : vector<8xf32>
    %31 = vector.multi_reduction <maximumf>, %30, %cst_23 [1] : vector<8x128xf32> to vector<8xf32>
    %32 = vector.shape_cast %31 : vector<8xf32> to vector<8x1xf32>
    %33 = vector.broadcast %32 : vector<8x1xf32> to vector<8x128xf32>
    %34 = arith.subf %30, %33 : vector<8x128xf32>
    %35 = math.exp %34 : vector<8x128xf32>
    %cst_24 = arith.constant dense<0.000000e+00> : vector<8xf32>
    %36 = vector.multi_reduction <add>, %35, %cst_24 [1] : vector<8x128xf32> to vector<8xf32>
    %37 = vector.shape_cast %36 : vector<8xf32> to vector<8x1xf32>
    %38 = math.log %37 : vector<8x1xf32>
    %39 = vector.broadcast %38 : vector<8x1xf32> to vector<8x128xf32>
    %40 = arith.subf %34, %39 : vector<8x128xf32>
    %41 = arith.truncf %40 : vector<8x128xf32> to vector<8x128xbf16>
    %c0_25 = arith.constant 0 : index
    %c0_26 = arith.constant 0 : index
    %42 = vector.load %arg10[%c0_25, %c0_26] : memref<8x128xbf16, #tpu.memory_space<vmem>>, vector<8x128xbf16>
    tpu.vector_store %arg10[%c0_25, %c0_26], %41 {strides = array<i32>} : memref<8x128xbf16, #tpu.memory_space<vmem>>, vector<8x128xbf16>,
    return
  }
  func.func @transform_0(%arg0: i32) -> (i32, i32) {
    %c0_i32 = arith.constant 0 : i32
    %c0_i32_0 = arith.constant 0 : i32
    return %arg0, %c0_i32 : i32, i32
  }
  func.func @transform_1(%arg0: i32) -> (i32, i32) {
    %c0_i32 = arith.constant 0 : i32
    %c0_i32_0 = arith.constant 0 : i32
    %c0_i32_1 = arith.constant 0 : i32
    return %c0_i32, %c0_i32_0 : i32, i32
  }
  func.func @transform_2(%arg0: i32) -> (i32, i32) {
    %c0_i32 = arith.constant 0 : i32
    %c0_i32_0 = arith.constant 0 : i32
    %c0_i32_1 = arith.constant 0 : i32
    return %c0_i32, %c0_i32_0 : i32, i32
  }
  func.func @transform_3(%arg0: i32) -> (i32, i32) {
    %c0_i32 = arith.constant 0 : i32
    %c0_i32_0 = arith.constant 0 : i32
    %c0_i32_1 = arith.constant 0 : i32
    return %c0_i32, %c0_i32_0 : i32, i32
  }
  func.func @transform_4(%arg0: i32) -> (i32, i32) {
    %c0_i32 = arith.constant 0 : i32
    %c0_i32_0 = arith.constant 0 : i32
    %c0_i32_1 = arith.constant 0 : i32
    return %c0_i32, %c0_i32_0 : i32, i32
  }
  func.func @transform_5(%arg0: i32) -> (i32, i32) {
    %c0_i32 = arith.constant 0 : i32
    %c0_i32_0 = arith.constant 0 : i32
    %c0_i32_1 = arith.constant 0 : i32
    return %c0_i32, %c0_i32_0 : i32, i32
  }
  func.func @transform_6(%arg0: i32) -> (i32, i32) {
    %c0_i32 = arith.constant 0 : i32
    %c0_i32_0 = arith.constant 0 : i32
    %c0_i32_1 = arith.constant 0 : i32
    return %c0_i32, %c0_i32_0 : i32, i32
  }
  func.func @transform_7(%arg0: i32) -> (i32, i32) {
    %c0_i32 = arith.constant 0 : i32
    %c0_i32_0 = arith.constant 0 : i32
    %c0_i32_1 = arith.constant 0 : i32
    return %c0_i32, %c0_i32_0 : i32, i32
  }
  func.func @transform_8(%arg0: i32) -> (i32, i32) {
    %c0_i32 = arith.constant 0 : i32
    %c0_i32_0 = arith.constant 0 : i32
    %c0_i32_1 = arith.constant 0 : i32
    return %c0_i32, %c0_i32_0 : i32, i32
  }
  func.func @transform_9(%arg0: i32) -> (i32, i32) {
    %c0_i32 = arith.constant 0 : i32
    %c0_i32_0 = arith.constant 0 : i32
    return %arg0, %c0_i32 : i32, i32
  }
}

</mosaic_0001>

<bundles_post_ra>
// kernel: tpu_custom_call.1
= control target key start
LH: loop header
LB: loop body
LE: loop exit
PB: predicated region body
PF: predicated region fallthrough
CT: control target
= control target key end

     0   :  { %v1176_v44 = vmov 0.0   ;;  %vm1177_vm0 = vmmov 0   ;;  %vm447_vm1 = vcmask 130048   ;;  %s1481_s0 = inlined_call_operand.vmem [shape: f32[8,784], index: 0, kind: input, shape index: {}]   ;;  %s1482_s1 = inlined_call_operand.vmem [shape: bf16[784,64], index: 1, kind: input, shape index: {}]   ;;  %s1483_s2 = inlined_call_operand.vmem [shape: f32[1,64], index: 2, kind: input, shape index: {}]   ;;  %s1484_s3 = inlined_call_operand.vmem [shape: bf16[64,64], index: 3, kind: input, shape index: {}]   ;;  %s1485_s4 = inlined_call_operand.vmem [shape: f32[1,64], index: 4, kind: input, shape index: {}]   ;;  %s1486_s5 = inlined_call_operand.vmem [shape: bf16[64,64], index: 5, kind: input, shape index: {}]   ;;  %s1487_s6 = inlined_call_operand.vmem [shape: f32[1,64], index: 6, kind: input, shape index: {}]   ;;  %s1488_s7 = inlined_call_operand.vmem [shape: bf16[64,128], index: 7, kind: input, shape index: {}]   ;;  %s1489_s8 = inlined_call_operand.vmem [shape: f32[1,128], index: 8, kind: input, shape index: {}]   ;;  %s1490_s9 = inlined_call_operand.hbm [shape: bf16[8,128], index: 9, kind: output, shape index: {}]  }
   0x1   :  { %v1087_v0 = vld [vmem:[%s1482_s1 + $0x40] sm:$0xff]   ;;  %v1091_v4 = vld [vmem:[%s1482_s1 + $0x48] sm:$0xff]   ;;  %v1095_v8 = vld [vmem:[%s1482_s1 + $0x50] sm:$0xff]  }
   0x2   :  { %v1088_v1 = vld [vmem:[%s1482_s1] sm:$0xff]   ;;  %959 = vmatprep.subr.bf16.mxu0 %v1087_v0  ;;  %v1092_v5 = vld [vmem:[%s1482_s1 + $0x8] sm:$0xff]   ;;  %v1096_v9 = vld [vmem:[%s1482_s1 + $0x10] sm:$0xff]  }
   0x3   :  { %v1089_v2 = vld [vmem:[%s1482_s1 + $0xc0] sm:$0xff]   ;;  %960 = vmatpush3.bf16.msra.mxu0 %v1088_v1  ;;  %v1093_v6 = vld [vmem:[%s1482_s1 + $0xc8] sm:$0xff]   ;;  %v1097_v10 = vld [vmem:[%s1482_s1 + $0xd0] sm:$0xff]  }
   0x4   :  { %v1090_v3 = vld [vmem:[%s1482_s1 + $0x80] sm:$0xff]   ;;  %981 = vmatprep.subr.bf16.mxu1 %v1089_v2  ;;  %961 = vmatprep.subr.bf16.mxu0 %v1091_v4  ;;  %v1094_v7 = vld [vmem:[%s1482_s1 + $0x88] sm:$0xff]   ;;  %v1098_v11 = vld [vmem:[%s1482_s1 + $0x90] sm:$0xff]  }
   0x5   :  { %982 = vmatpush3.bf16.msra.mxu1 %v1090_v3  ;;  %v1099_v12 = vld [vmem:[%s1482_s1 + $0x58] sm:$0xff]   ;;  %v1103_v16 = vld [vmem:[%s1482_s1 + $0x60] sm:$0xff]   ;;  %v1107_v20 = vld [vmem:[%s1482_s1 + $0x68] sm:$0xff]  }
   0x6   :  { %983 = vmatprep.subr.bf16.mxu1 %v1093_v6  ;;  %v1100_v13 = vld [vmem:[%s1482_s1 + $0x18] sm:$0xff]   ;;  %v1104_v17 = vld [vmem:[%s1482_s1 + $0x20] sm:$0xff]   ;;  %v1108_v21 = vld [vmem:[%s1482_s1 + $0x28] sm:$0xff]  }
   0x7   :  { %962 = vmatpush3.bf16.msra.mxu0 %v1092_v5  ;;  %v1101_v14 = vld [vmem:[%s1482_s1 + $0xd8] sm:$0xff]   ;;  %v1105_v18 = vld [vmem:[%s1482_s1 + $0xe0] sm:$0xff]   ;;  %v1109_v22 = vld [vmem:[%s1482_s1 + $0xe8] sm:$0xff]  }
   0x8   :  { %963 = vmatprep.subr.bf16.mxu0 %v1095_v8  ;;  %v1102_v15 = vld [vmem:[%s1482_s1 + $0x98] sm:$0xff]   ;;  %v1106_v19 = vld [vmem:[%s1482_s1 + $0xa0] sm:$0xff]   ;;  %v1110_v23 = vld [vmem:[%s1482_s1 + $0xa8] sm:$0xff]  }
   0x9   :  { %984 = vmatpush3.bf16.msra.mxu1 %v1094_v7  ;;  %v1111_v24 = vld [vmem:[%s1482_s1 + $0x70] sm:$0xff]   ;;  %v1115_v28 = vld [vmem:[%s1482_s1 + $0x78] sm:$0xff]   ;;  %v35_v31 = vld [vmem:[%s1481_s0 + $0x8] sm:$0xff] }
   0xa   :  { %985 = vmatprep.subr.bf16.mxu1 %v1097_v10  ;;  %v1112_v25 = vld [vmem:[%s1482_s1 + $0x30] sm:$0xff]   ;;  %v1116_v29 = vld [vmem:[%s1482_s1 + $0x38] sm:$0xff]   ;;  %v42_v32 = vpack.c.bf16 %v35_v31, %v35_v31  ;;  %v34_v34 = vld [vmem:[%s1481_s0] sm:$0xff] }
   0xb   :  { %964 = vmatpush3.bf16.msra.mxu0 %v1096_v9  ;;  %v1113_v26 = vld [vmem:[%s1482_s1 + $0xf0] sm:$0xff]   ;;  %v1117_v30 = vld [vmem:[%s1482_s1 + $0xf8] sm:$0xff]   ;;  %v41_v35 = vpack.c.bf16 %v34_v34, %v34_v34  ;;  %v1119_v36 = vld [vmem:[%s1482_s1 + $0x140] sm:$0xff]  }
   0xc   :  { %965 = vmatprep.subr.bf16.mxu0 %v1099_v12  ;;  %v1114_v27 = vld [vmem:[%s1482_s1 + $0xb0] sm:$0xff]   ;;  %v1118_v33 = vld [vmem:[%s1482_s1 + $0xb8] sm:$0xff]   ;;  %483 = vmatprep.mubr.bf16.mxu0 %v42_v32  ;;  %v1120_v39 = vld [vmem:[%s1482_s1 + $0x100] sm:$0xff]  }
   0xd   :  { %986 = vmatpush3.bf16.msra.mxu1 %v1098_v11  ;;  %v37_v37 = vld [vmem:[%s1481_s0 + $0x18] sm:$0xff]  ;;  %v36_v40 = vld [vmem:[%s1481_s0 + $0x10] sm:$0xff]  ;;  %v1121_v42 = vld [vmem:[%s1482_s1 + $0x148] sm:$0xff]  }
   0xe   :  { %987 = vmatprep.subr.bf16.mxu1 %v1101_v14  ;;  %v44_v38 = vpack.c.bf16 %v37_v37, %v37_v37  ;;  %v43_v41 = vpack.c.bf16 %v36_v40, %v36_v40  ;;  %v1122_v43 = vld [vmem:[%s1482_s1 + $0x108] sm:$0xff]   ;;  %v1123_v45 = vld [vmem:[%s1482_s1 + $0x150] sm:$0xff]   ;;  %v1125_v47 = vld [vmem:[%s1482_s1 + $0x158] sm:$0xff]  }
   0xf   :  { %966 = vmatpush3.bf16.msra.mxu0 %v1100_v13  ;;  %v1124_v46 = vld [vmem:[%s1482_s1 + $0x110] sm:$0xff]   ;;  %v1126_v48 = vld [vmem:[%s1482_s1 + $0x118] sm:$0xff]   ;;  %v1127_v49 = vld [vmem:[%s1482_s1 + $0x160] sm:$0xff]  }
  0x10   :  { %967 = vmatprep.subr.bf16.mxu0 %v1103_v16  ;;  %523 = vmatprep.mubr.bf16.mxu1 %v44_v38  ;;  %v1128_v50 = vld [vmem:[%s1482_s1 + $0x120] sm:$0xff]   ;;  %v1129_v51 = vld [vmem:[%s1482_s1 + $0x168] sm:$0xff]   ;;  %v1131_v55 = vld [vmem:[%s1482_s1 + $0x170] sm:$0xff]  }
  0x11   :  { %988 = vmatpush3.bf16.msra.mxu1 %v1102_v15  ;;  %v1130_v52 = vld [vmem:[%s1482_s1 + $0x128] sm:$0xff]   ;;  %v1135_v53 = vld [vmem:[%s1482_s1 + $0x180] sm:$0xff]   ;;  %v40_v57 = vld [vmem:[%s1481_s0 + $0x30] sm:$0xff] }
  0x12   :  { %989 = vmatprep.subr.bf16.mxu1 %v1105_v18  ;;  %v39_v54 = vld [vmem:[%s1481_s0 + $0x28] sm:$0xff]  ;;  %v47_v58 = vpack.c.bf16 %v40_v57, %v40_v57  ;;  %v1132_v59 = vld [vmem:[%s1482_s1 + $0x130] sm:$0xff]   ;;  %v1133_v60 = vld [vmem:[%s1482_s1 + $0x178] sm:$0xff]  }
  0x13   :  { %968 = vmatpush3.bf16.msra.mxu0 %v1104_v17  ;;  %v46_v56 = vpack.c.bf16 %v39_v54, %v39_v54 }
  0x14   :  { %969 = vmatprep.subr.bf16.mxu0 %v1107_v20 }
  0x15   :  { %990 = vmatpush3.bf16.msra.mxu1 %v1106_v19 }
  0x16   :  { %991 = vmatprep.subr.bf16.mxu1 %v1109_v22 }
  0x17   :  { %970 = vmatpush3.bf16.msra.mxu0 %v1108_v21 }
  0x18   :  { %971 = vmatprep.subr.bf16.mxu0 %v1111_v24 }
  0x19   :  { %992 = vmatpush3.bf16.msra.mxu1 %v1110_v23 }
  0x1a   :  { %993 = vmatprep.subr.bf16.mxu1 %v1113_v26 }
  0x1b   :  { %972 = vmatpush3.bf16.msra.mxu0 %v1112_v25 }
  0x1c   :  { %973 = vmatprep.subr.bf16.mxu0 %v1115_v28 }
  0x1d   :  { %994 = vmatpush3.bf16.msra.mxu1 %v1114_v27 }
  0x1e   :  { %995 = vmatprep.subr.bf16.mxu1 %v1117_v30 }
  0x1f   :  { %974 = vmatpush3.bf16.msra.mxu0 %v1116_v29 }
  0x20   :  { %1003 = vmatprep.subr.bf16.mxu0 %v1119_v36 }
  0x21   :  { %996 = vmatpush3.bf16.msra.mxu1 %v1118_v33 }
  0x22   :  { %484 = vmatmul.mubr.bf16.vlgmr.msra.gmra.mrb[0].mxu0 %v41_v35  ;;  %1042 = vmatprep.subr.bf16.mxu1 %v1176_v44 }
  0x23   :  { %1004 = vmatpush3.bf16.msra.mxu0 %v1120_v39  ;;  %563 = vmatprep.mubr.bf16.mxu0 %v46_v56 }
  0x24   :  { %524 = vmatmul.mubr.bf16.vlgmr.msra.gmra.mrb[0].mxu1 %v43_v41  ;;  %1005 = vmatprep.subr.bf16.mxu0 %v1121_v42 }
  0x25   :  { %1044 = vmatprep.mubr.msk.bf16.mxu1 %vm1177_vm0, %v1176_v44  ;;  %1043 = vmatpush3.bf16.msra.mxu1 %v1135_v53 }
  0x26   :  { %1048 = vmatprep.subr.bf16.mxu1 %v1176_v44 }
  0x27   :  { %1006 = vmatpush3.bf16.msra.mxu0 %v1122_v43 }
  0x28   :  { %1007 = vmatprep.subr.bf16.mxu0 %v1123_v45 }
  0x2b   :  { %1008 = vmatpush3.bf16.msra.mxu0 %v1124_v46 }
  0x2c   :  { %1009 = vmatprep.subr.bf16.mxu0 %v1125_v47  ;;  %1045 = vmatmul.mubr.msk.bf16.vlgmr.msra.gmra.mrb[4].mxu1 %vm447_vm1, %v47_v58 }
  0x2d   :  { %1056 = vmatprep.mubr.msk.bf16.mxu1 %vm1177_vm0, %v1176_v44 }
  0x2f   :  { %1010 = vmatpush3.bf16.msra.mxu0 %v1126_v48 }
  0x30   :  { %1011 = vmatprep.subr.bf16.mxu0 %v1127_v49 }
  0x33   :  { %1012 = vmatpush3.bf16.msra.mxu0 %v1128_v50 }
  0x34   :  { %1013 = vmatprep.subr.bf16.mxu0 %v1129_v51 }
  0x37   :  { %1014 = vmatpush3.bf16.msra.mxu0 %v1130_v52 }
  0x38   :  { %1015 = vmatprep.subr.bf16.mxu0 %v1131_v55 }
  0x39   :  { %14 = vsyncpa [#allocation3], 0  ;;  %v1134_v61 = vld [vmem:[%s1482_s1 + $0x138] sm:$0xff]   ;;  %v38_v62 = vld [vmem:[%s1481_s0 + $0x20] sm:$0xff]  ;;  %vm652_vm2 = vcmask 523264  }
  0x3a   :  { %v45_v63 = vpack.c.bf16 %v38_v62, %v38_v62  ;;  %v1136_v0 = vld [vmem:[%s1484_s3] sm:$0xff]   ;;  %v1137_v1 = vld [vmem:[%s1484_s3 + $0x8] sm:$0xff]   ;;  %v1138_v2 = vld [vmem:[%s1484_s3 + $0x10] sm:$0xff]  }
  0x3b   :  { %1016 = vmatpush3.bf16.msra.mxu0 %v1132_v59  ;;  %1049 = vmatpush3.bf16.msra.mxu1 %v1136_v0  ;;  %v1139_v3 = vld [vmem:[%s1484_s3 + $0x18] sm:$0xff]   ;;  %v890_v5 = vld [vmem:[%s1483_s2] ss:$0 sm:$0xff]  ;;  %v1141_v31 = vld [vmem:[%s1486_s5 + $0x8] sm:$0xff]  }
  0x3c   :  { %1017 = vmatprep.subr.bf16.mxu0 %v1133_v60  ;;  %1050 = vmatprep.subr.bf16.mxu1 %v1176_v44  ;;  %v1140_v29 = vld [vmem:[%s1486_s5] sm:$0xff]   ;;  %v1142_v32 = vld [vmem:[%s1486_s5 + $0x10] sm:$0xff]   ;;  %v1143_v33 = vld [vmem:[%s1486_s5 + $0x18] sm:$0xff]  }
  0x3d   :  { %v1144_v34 = vld [vmem:[%s1488_s7] sm:$0xff]   ;;  %v1145_v35 = vld [vmem:[%s1488_s7 + $0x8] sm:$0xff]   ;;  %v1146_v45 = vld [vmem:[%s1488_s7 + $0x10] sm:$0xff]  }
  0x3e   :  { %v941_v36 = vld [vmem:[%s1485_s4] ss:$0 sm:$0xff]  ;;  %v1147_v46 = vld [vmem:[%s1488_s7 + $0x18] sm:$0xff]  }
  0x3f   :  { %1018 = vmatpush3.bf16.msra.mxu0 %v1134_v61  ;;  %1051 = vmatpush3.bf16.msra.mxu1 %v1137_v1  ;;  %v947_v47 = vld [vmem:[%s1487_s6] ss:$0 sm:$0xff]  ;;  %s1178_s6 = smov [#allocation2]  }
  0x40   :  { %1072 = vmatprep.subr.bf16.mxu0 %v1176_v44  ;;  %1052 = vmatprep.subr.bf16.mxu1 %v1176_v44  ;;  %s882_s7 = sshll.u32 %s1178_s6, 4  ;;  %s883_s7 = int_to_ptr.vmem [resolvable:$true] %s882_s7 }
  0x41   :  { %p1157_p1 = scmp.lt.s32.totalorder %s883_s7, %s883_s7 }
  0x42   :  { %564 = vmatmul.mubr.bf16.vlgmr.msra.gmra.mrb[4].mxu0 %v45_v63 }
  0x43   :  { %1080 = vmatprep.mubr.msk.bf16.mxu0 %vm1177_vm0, %v1176_v44  ;;  %1053 = vmatpush3.bf16.msra.mxu1 %v1138_v2 }
  0x44   :  { %1054 = vmatprep.subr.bf16.mxu1 %v1176_v44  ;;  %1073 = vmatpush3.bf16.msra.mxu0 %v1144_v34 }
  0x45   :  { %1074 = vmatprep.subr.bf16.mxu0 %v1176_v44 }
  0x47   :  { %1055 = vmatpush3.bf16.msra.mxu1 %v1139_v3 }
  0x48   :  { %1060 = vmatprep.subr.bf16.mxu1 %v1176_v44  ;;  %1075 = vmatpush3.bf16.msra.mxu0 %v1145_v35 }
  0x49   :  { %1076 = vmatprep.subr.bf16.mxu0 %v1176_v44 }
  0x4c   :  { %1077 = vmatpush3.bf16.msra.mxu0 %v1146_v45 }
  0x4d   :  { %1078 = vmatprep.subr.bf16.mxu0 %v1176_v44 }
  0x50   :  { %1079 = vmatpush3.bf16.msra.mxu0 %v1147_v46 }
  0xf5   :  { %v975_v4 = vpop.f32.mrb[0].mxu0 }
  0xf6   :  { %v976_v6 = vpop.f32.mrb[1].mxu0 }
  0xf7   :  { %v977_v7 = vadd.f32 %v976_v6, %v975_v4  ;;  %v978_v8 = vpop.f32.mrb[2].mxu0  ;;  %v997_v9 = vpop.f32.mrb[0].mxu1 }
  0xf8   :  { %v979_v10 = vpop.f32.mrb[3].mxu0  ;;  %v998_v12 = vpop.f32.mrb[1].mxu1 }
  0xf9   :  { %v486_v11 = vadd.f32 %v977_v7, %v890_v5  ;;  %v999_v13 = vadd.f32 %v998_v12, %v997_v9  ;;  %v1000_v14 = vpop.f32.mrb[2].mxu1 }
  0xfa   :  { %v1001_v15 = vpop.f32.mrb[3].mxu1 }
  0xfb   :  { %v526_v16 = vadd.f32 %v999_v13, %v486_v11 }
  0xff   :  { %v605_v17 = vpop.f32.mrb[4].mxu1 }
 0x100   :  { %v1046_v18 = vpop.f32.mrb[5].mxu1 }
 0x101   :  { %v608_v19 = vpop.f32.mrb[6].mxu1 }
 0x102   :  { %v1047_v20 = vpop.f32.mrb[7].mxu1 }
 0x115   :  { %v1019_v21 = vpop.f32.mrb[4].mxu0 }
 0x116   :  { %v1020_v22 = vpop.f32.mrb[5].mxu0 }
 0x117   :  { %v1021_v23 = vadd.f32 %v1020_v22, %v1019_v21  ;;  %v1022_v24 = vpop.f32.mrb[6].mxu0 }
 0x118   :  { %v1023_v25 = vpop.f32.mrb[7].mxu0 }
 0x119   :  { %v566_v26 = vadd.f32 %v1021_v23, %v526_v16 }
 0x11b   :  { %v606_v27 = vadd.f32 %v605_v17, %v566_v26 }
 0x11d   :  { %v611_v28 = vmax.f32 %v606_v27, 0.0 }
 0x11f   :  { %v612_v30 = vpack.c.bf16 %v611_v28, %v611_v28 }
 0x121   :  { %1057 = vmatmul.mubr.msk.bf16.vlgmr.msra.gmra.mrb[8].mxu1 %vm652_vm2, %v612_v30 }
 0x122   :  { %1061 = vmatpush3.bf16.msra.mxu1 %v1140_v29  ;;  %1068 = vmatprep.mubr.msk.bf16.mxu1 %vm1177_vm0, %v1176_v44 }
 0x123   :  { %1062 = vmatprep.subr.bf16.mxu1 %v1176_v44 }
 0x126   :  { %1063 = vmatpush3.bf16.msra.mxu1 %v1141_v31 }
 0x127   :  { %1064 = vmatprep.subr.bf16.mxu1 %v1176_v44 }
 0x12a   :  { %1065 = vmatpush3.bf16.msra.mxu1 %v1142_v32 }
 0x12b   :  { %1066 = vmatprep.subr.bf16.mxu1 %v1176_v44  ;;  %v953_v44 = vld [vmem:[%s1489_s8] ss:$0 sm:$0xff]  ;;  %s1152_s8 = scalar_lea.vmem %s883_s7, 64 }
 0x12c   :  { %p1153_p0 = scmp.ne.s32.totalorder %s883_s7, %s1152_s8  ;;  %p1158_p2 = scmp.lt.s32.totalorder %s1152_s8, %s1152_s8 }
 0x12e   :  { %1067 = vmatpush3.bf16.msra.mxu1 %v1143_v33  ;;  %p1159_p3 = por %p1158_p2, %p1157_p1 }
 0x130   :  { %p1160_p4 = pnand %p1159_p3, %p1153_p0 }
 0x1f4   :  { %v690_v37 = vpop.f32.mrb[8].mxu1 }
 0x1f5   :  { %v691_v38 = vadd.f32 %v941_v36, %v690_v37  ;;  %v1058_v39 = vpop.f32.mrb[9].mxu1 }
 0x1f6   :  { %v693_v40 = vpop.f32.mrb[10].mxu1 }
 0x1f7   :  { %v696_v41 = vmax.f32 %v691_v38, 0.0  ;;  %v1059_v42 = vpop.f32.mrb[11].mxu1 }
 0x1f9   :  { %v697_v43 = vpack.c.bf16 %v696_v41, %v696_v41 }
 0x1fb   :  { %1069 = vmatmul.mubr.msk.bf16.vlgmr.msra.gmra.mrb[12].mxu1 %vm652_vm2, %v697_v43 }
 0x2ce   :  { %v774_v48 = vpop.f32.mrb[12].mxu1 }
 0x2cf   :  { %v775_v49 = vadd.f32 %v947_v47, %v774_v48  ;;  %v1070_v50 = vpop.f32.mrb[13].mxu1 }
 0x2d0   :  { %v777_v51 = vpop.f32.mrb[14].mxu1 }
 0x2d1   :  { %v780_v52 = vmax.f32 %v775_v49, 0.0  ;;  %v1071_v53 = vpop.f32.mrb[15].mxu1 }
 0x2d3   :  { %v781_v54 = vpack.c.bf16 %v780_v52, %v780_v52 }
 0x2d5   :  { %1081 = vmatmul.mubr.msk.bf16.vlgmr.msra.gmra.mrb[8].mxu0 %vm652_vm2, %v781_v54 }
 0x3a8   :  { %v858_v55 = vpop.f32.mrb[8].mxu0 }
 0x3a9   :  { %v859_v56 = vadd.f32 %v953_v44, %v858_v55  ;;  %v1082_v57 = vpop.f32.mrb[9].mxu0 }
 0x3aa   :  { %v861_v58 = vpop.f32.mrb[10].mxu0 }
 0x3ab   :  { %864 = vmax.xlane.f32.xlu0 %v859_v56  ;;  %v1083_v59 = vpop.f32.mrb[11].mxu0 }
 0x438   :  { %v865_v60 = vpop.xlane.xlu0 %864 }
 0x439   :  { %v866_v61 = vsub.f32 %v859_v56, %v865_v60 }
 0x43b   :  { %v867_v62 = vmul.f32 1.442695, %v866_v61 }
 0x43d   :  { %1148 = vpow2.f32 %v867_v62 }
 0x447   :  { %v1149_v63 = vpop.eup %1148 }
 0x448   :  { %869 = vadd.xlane.f32.xlu0 %v1149_v63 }
 0x4d5   :  { %v870_v0 = vpop.xlane.xlu0 %869 }
 0x4d6   :  { %1150 = vlog2.f32 %v870_v0 }
 0x4e0   :  { %v1151_v1 = vpop.eup %1150 }
 0x4e1   :  { %v872_v2 = vmul.f32 0.6931472, %v1151_v1 }
 0x4e3   :  { %v873_v3 = vsub.f32 %v866_v61, %v872_v2 }
 0x4e5   :  { %v874_v4 = vpack.c.bf16 %v873_v3, %v873_v3 }
 0x4e7   :  { %875 = vst [vmem:[#allocation2] sm:$0xf] %v874_v4 }
 0x4e8   :  { %1163 = shalt.err (!%p1160_p4)
}
 0x4e9   :  { %s1164_s21 = scalar_lea.hbm %s1490_s9, 64 }
 0x4ea   :  { %p1165_p5 = scmp.ne.s32.totalorder %s1490_s9, %s1164_s21  ;;  %p1168_p6 = scmp.lt.u32.totalorder %s1164_s21, %s1490_s9 }
 0x4ec   :  { %p1170_p7 = pnand %p1168_p6, %p1165_p5 }
 0x4ee   :  { %1173 = shalt.err (!%p1170_p7)
}
 0x4ef   :  { %885 = dma.vmem_to_hbm [thread:$0]  %s883_s7, 64, %s1490_s9, [#allocation3]  }
 0x4f0   :  { %1174 = dma.done.wait [#allocation3], 64  }
 0x4f1   :  { %1175 = vsyncadd [#allocation3], 4294967232 }
 0x4f2   :  { %889 = vsyncpa [#allocation3], 1 }

</bundles_post_ra>
